<compile_context>
chip_gen: v6e
topology: v6e:2x2x1
jax: 0.10.0
libtpu: 0.0.40
codegen_flags: <defaults>
</compile_context>

<pallas_src>
import jax
import jax.numpy as jnp
from jax.experimental import pallas as pl
from jax.experimental.pallas import tpu as pltpu


_SMALL_BYTES = 1 << 20         # below this, fused XLA add beats a custom call
_TARGET_BLOCK_BYTES = 2 << 20  # ~2 MiB blocks: HBM-roofline plateau on v5e/v6e/v7x
_LANE_CANDIDATES = (4096, 2048, 1024, 512, 256, 128)


def _plus_one_kernel(r1_ref, o_ref):
    # Pure VPU element-wise add over a lane-dense tile (unmasked vst stores).
    o_ref[...] = r1_ref[...] + 1


def plus_one(r1, *, force_pallas=False):
    """Element-wise r1 + 1.

    Tiny inputs (the module's real use case) take a plain XLA fast path.
    Large inputs are flattened and re-tiled into wide lane-dense ~2 MiB
    blocks, streamed through a single row-tiled pallas_call and written back
    in place (input buffer is donated via input_output_aliases).
    """
    if r1.size == 0:
        return r1 + 1

    itemsize = jnp.dtype(r1.dtype).itemsize
    nbytes = r1.size * itemsize

    # Fast path: custom-call dispatch + per-step overhead dominates tiny
    # tensors; a fused XLA elementwise add is strictly faster.
    if (not force_pallas) and nbytes < _SMALL_BYTES:
        return r1 + 1

    n = r1.size
    # Widest lane (multiple of 128) that divides the flat length -> wide,
    # unmasked stores and no dependence on the original trailing dim.
    lane = next((c for c in _LANE_CANDIDATES if n % c == 0), 0)
    if lane == 0:
        # Flat length not a multiple of 128: a ragged tail would need an
        # extra concat/copy pass that costs more than the kernel saves.
        return r1 + 1

    rows = n // lane
    r2d = r1.reshape(rows, lane)   # metadata-only for an elementwise op

    # ~2 MiB per block; in+out double-buffered (4x) fits default scoped VMEM
    # on all generations, including v7x's halved VMEM.
    row_tile = max(8, _TARGET_BLOCK_BYTES // (lane * itemsize))
    row_tile = min(row_tile, rows)
    if row_tile != rows:
        # Keep block_shape (8, 128)-aligned when it does not span the array.
        row_tile = (row_tile // 8) * 8

    grid = (pl.cdiv(rows, row_tile),)

    out = pl.pallas_call(
        _plus_one_kernel,
        out_shape=jax.ShapeDtypeStruct((rows, lane), r1.dtype),
        grid_spec=pltpu.PrefetchScalarGridSpec(
            num_scalar_prefetch=0,
            grid=grid,
            in_specs=[pl.BlockSpec((row_tile, lane), lambda i: (i, 0))],
            out_specs=pl.BlockSpec((row_tile, lane), lambda i: (i, 0)),
        ),
        # In-place +1 over r1's buffer (r1 is donated to this call).
        input_output_aliases={0: 0},
        compiler_params=pltpu.CompilerParams(
            dimension_semantics=("parallel",)),
    )(r2d)
    return out.reshape(r1.shape)


def plus_one_wrapper_forward(wrapped_fn, *inputs):
    """Forward pass of PlusOneWrapper around an arbitrary wrapped callable."""
    # TODO(synk): `self.wrapped` is an arbitrary user-supplied module; it is
    # treated as an external JAX callable here — only the wrapper's own `+1`
    # on the first output is implemented as a Pallas kernel.
    r1, r2, r3, r4 = wrapped_fn(*inputs)
    return plus_one(r1), r2, r3, r4


if __name__ == "__main__":
    key = jax.random.PRNGKey(0)
    k1, k2, k3, k4, kx, k5, k6 = jax.random.split(key, 7)

    # Small shapes consistent with the module: the wrapped Sender emits a
    # token-id message [batch, seq] plus three per-step float tensors.
    batch, seq = 16, 8
    msg_ids = jax.random.randint(k1, (batch, seq), 0, 100, dtype=jnp.int32)
    log_probs = jax.random.normal(k2, (batch, seq), dtype=jnp.float32)
    entropy = jax.random.normal(k3, (batch, seq), dtype=jnp.float32)
    aux = jax.random.normal(k4, (batch, seq), dtype=jnp.float32)

    def toy_wrapped(x):
        # Stand-in for the wrapped Sender module (external to the wrapper).
        del x
        return msg_ids, log_probs, entropy, aux

    x_in = jax.random.normal(kx, (batch, 4), dtype=jnp.float32)

    # 1) Wrapper forward on real (tiny) shapes -> small-input fast path.
    r1p, r2o, r3o, r4o = plus_one_wrapper_forward(toy_wrapped, x_in)
    r1p = jax.block_until_ready(r1p)
    assert r1p.shape == msg_ids.shape and r1p.dtype == msg_ids.dtype
    assert jnp.array_equal(r1p, msg_ids + 1)
    assert jnp.array_equal(r2o, log_probs)
    assert jnp.array_equal(r3o, entropy)
    assert jnp.array_equal(r4o, aux)

    # 2) Exercise the Pallas path explicitly (bypass the small-input fast
    #    path) on small lane-dense tensors, int32 and f32, 2D and 3D.
    forced = jax.jit(lambda t: plus_one(t, force_pallas=True))

    small_ids = jax.random.randint(k5, (16, 128), 0, 100, dtype=jnp.int32)
    out_ids = jax.block_until_ready(forced(small_ids))
    assert out_ids.dtype == jnp.int32
    assert jnp.array_equal(out_ids, small_ids + 1)

    small_f32 = jax.random.normal(k6, (64, 3, 256), dtype=jnp.float32)
    out_f32 = jax.block_until_ready(forced(small_f32))
    assert out_f32.shape == small_f32.shape
    assert jnp.array_equal(out_f32, small_f32 + 1.0)

    print("KERNEL_OK")
</pallas_src>

<mosaic_0001>
module attributes {stable_mosaic.version = 11 : i64} {
  func.func @_plus_one_kernel(%arg0: i32, %arg1: memref<1x2048xi32, #tpu.memory_space<vmem>>, %arg2: memref<1x2048xi32, #tpu.memory_space<vmem>>) attributes {dimension_semantics = [#tpu.dimension_semantics<parallel>], iteration_bounds = array<i64: 1>, scalar_prefetch = 0 : i64, scratch_operands = 0 : i64, tpu.core_type = #tpu.core_type<tc>, window_params = [{transform_indices = @transform_0, window_bounds = array<i64: 1, 2048>}, {transform_indices = @transform_1, window_bounds = array<i64: 1, 2048>}]} {
    %c0 = arith.constant 0 : index
    %c0_0 = arith.constant 0 : index
    %0 = vector.load %arg1[%c0, %c0_0] : memref<1x2048xi32, #tpu.memory_space<vmem>>, vector<1x2048xi32>
    %c1_i32 = arith.constant 1 : i32
    %1 = vector.broadcast %c1_i32 : i32 to vector<1x2048xi32>
    %2 = arith.addi %0, %1 : vector<1x2048xi32>
    %c0_1 = arith.constant 0 : index
    %c0_2 = arith.constant 0 : index
    %3 = vector.load %arg2[%c0_1, %c0_2] : memref<1x2048xi32, #tpu.memory_space<vmem>>, vector<1x2048xi32>
    tpu.vector_store %arg2[%c0_1, %c0_2], %2 {strides = array<i32>} : memref<1x2048xi32, #tpu.memory_space<vmem>>, vector<1x2048xi32>,
    return
  }
  func.func @transform_0(%arg0: i32) -> (i32, i32) {
    %c0_i32 = arith.constant 0 : i32
    %c0_i32_0 = arith.constant 0 : i32
    return %arg0, %c0_i32 : i32, i32
  }
  func.func @transform_1(%arg0: i32) -> (i32, i32) {
    %c0_i32 = arith.constant 0 : i32
    %c0_i32_0 = arith.constant 0 : i32
    return %arg0, %c0_i32 : i32, i32
  }
}

</mosaic_0001>

<bundles_post_ra>
// kernel: _lambda_.1
= control target key start
LH: loop header
LB: loop body
LE: loop exit
PB: predicated region body
PF: predicated region fallthrough
CT: control target
= control target key end

     0   :  { %s40_s0 = inlined_call_operand.vmem [shape: s32[1,2048], index: 0, kind: input, shape index: {}, may-alias: {0,1}]   ;;  %s41_s1 = inlined_call_operand.vmem [shape: s32[1,2048], index: 1, kind: output, shape index: {}, may-alias: {0,1}]  }
   0x1   :  { %v8_v0 = vld [vmem:[%s40_s0] sm:$0xff]  ;;  %v9_v1 = vld [vmem:[%s40_s0 + $0x8] sm:$0xff] }
   0x2   :  { %v10_v2 = vadd.s32 1, %v8_v0  ;;  %v11_v3 = vadd.s32 1, %v9_v1 }
   0x4   :  { %12 = vst [vmem:[%s41_s1] sm:$0xff] %v10_v2  ;;  %13 = vst [vmem:[%s41_s1 + $0x8] sm:$0xff] %v11_v3 }

</bundles_post_ra>
